<compile_context>
chip_gen: v6e
topology: v6e:2x2x1
jax: 0.10.0
libtpu: 0.0.40
codegen_flags: <defaults>
</compile_context>

<pallas_src>
import functools

import jax
import jax.numpy as jnp
from jax.experimental import pallas as pl
from jax.experimental.pallas import tpu as pltpu

LANE = 128


def _round_up(x, m):
    return (x + m - 1) // m * m


def _cdiv(a, b):
    return -(-a // b)


def _pad2d(a, rows, cols):
    """Zero-pad a 2-D array up to (rows, cols)."""
    out = jnp.zeros((rows, cols), a.dtype)
    return out.at[: a.shape[0], : a.shape[1]].set(a)


def _dynamics_kernel(x_ref,
                     w1_ref, b1_ref,
                     w2_ref, b2_ref,
                     w3c_ref, b3c_ref,
                     wr2_ref, rmask_ref,
                     out_ref, *, op_width):
    # Hoist broadcast-style reads (JAX does not CSE broadcast_in_dim).
    b1 = b1_ref[...]          # (1, Hp)
    b2 = b2_ref[...]          # (1, Hp)
    b3c = b3c_ref[...]        # (1, Op + Hp)   lane L of the nl half carries br2
    wr2 = wr2_ref[...]        # (1, Hp)        reward output weights as a row
    rmask = rmask_ref[...]    # (1, Op)        one-hot on lane L

    x = x_ref[...]            # (TB, Kp): [latent | action | 0-pad]
    wdt = w2_ref.dtype        # compute dtype of the MXU operands (f32 or bf16)

    # dynamics layer 1: Linear(2L -> H), ReLU   (single full-width matmul)
    h1 = jnp.maximum(
        jnp.dot(x, w1_ref[...], preferred_element_type=jnp.float32) + b1, 0.0)

    # dynamics layer 2: Linear(H -> H), ReLU
    h2 = jnp.maximum(
        jnp.dot(h1.astype(wdt), w2_ref[...],
                preferred_element_type=jnp.float32) + b2, 0.0)

    # Fused wide head: one (TB,Hp) x (Hp, Op+Hp) matmul producing
    #   lanes [0, Op)      : next_latent slab (padded cols >= L are zero except
    #                        lane L which holds br2),
    #   lanes [Op, Op+Hp)  : pre-ReLU reward hidden via the w3 -> wr1 fold
    #                        (no nonlinearity between them, so
    #                         relu(nl@wr1+br1) == relu(h2@(w3@wr1) + (b3@wr1+br1))).
    h3 = jnp.dot(h2.astype(wdt), w3c_ref[...],
                 preferred_element_type=jnp.float32) + b3c
    nl = h3[:, :op_width]
    r1 = jnp.maximum(h3[:, op_width:], 0.0)

    # Reward head: wr2 had a single useful output column, so instead of a
    # (TB,128)x(128,128) MXU op use a VPU multiply + XLU cross-lane reduce.
    rew = jnp.sum(r1 * wr2, axis=-1, keepdims=True)      # (TB, 1)

    # Single lane-dense, unmasked (TB, Op) store:
    #   lanes 0..L-1 = next_latent, lane L = predicted_reward (br2 already in nl).
    out_ref[...] = (nl + rew * rmask).astype(out_ref.dtype)


def pack_params(p, latent_dim, hidden_dim, compute_dtype=jnp.float32):
    """Pad / fuse PyTorch-layout params into lane-dense kernel operands."""
    L, H = latent_dim, hidden_dim
    Kp = _round_up(2 * L, LANE)       # padded concat-input width
    Hp = _round_up(H, LANE)           # padded hidden width
    Op = _round_up(L + 1, LANE)       # padded output-slab width (nl + reward lane)

    # Fold the (no-nonlinearity) w3 -> wr1 pair.
    w3r = p["w3"] @ p["wr1"]                       # (H, H)
    b3r = p["b3"] @ p["wr1"] + p["br1"]            # (1, H)

    # Wide fused head weight [w3_pad | w3r_pad]  (Hp, Op + Hp).
    w3c = jnp.concatenate([_pad2d(p["w3"], Hp, Op), _pad2d(w3r, Hp, Hp)], axis=1)

    # Bias slab: padded b3 with br2 folded into lane L (w3's padded column L is
    # zero, so nl lane L == br2 before the reward-dot is added).
    b3_slab = _pad2d(p["b3"], 1, Op).at[0, L].set(p["br2"][0, 0])
    b3c = jnp.concatenate([b3_slab, _pad2d(b3r, 1, Hp)], axis=1)

    # wr2 as a lane row-vector for the VPU multiply + reduce, and the one-hot
    # mask that routes the reward scalar to output lane L.
    wr2_row = _pad2d(p["wr2"].T, 1, Hp)                       # (1, Hp)
    rmask = jnp.zeros((1, Op), jnp.float32).at[0, L].set(1.0)  # (1, Op)

    packed = dict(
        w1=_pad2d(p["w1"], Kp, Hp).astype(compute_dtype),
        b1=_pad2d(p["b1"], 1, Hp),
        w2=_pad2d(p["w2"], Hp, Hp).astype(compute_dtype),
        b2=_pad2d(p["b2"], 1, Hp),
        w3c=w3c.astype(compute_dtype),
        b3c=b3c,
        wr2=wr2_row,
        rmask=rmask,
    )
    return packed, (Kp, Hp, Op)


def latent_dynamics_forward(latent_state, action_embedding, params, *,
                            block_b=512, compute_dtype=jnp.float32):
    """Pallas forward. latent_state/action_embedding: (B, L) -> (B, L), (B, 1)."""
    B, L = latent_state.shape
    H = params["w2"].shape[0]

    kp, (Kp, Hp, Op) = pack_params(params, L, H, compute_dtype)
    Wc = Op + Hp

    # Tile selection:
    #  * compute n_blocks first, then size TB to barely cover B (no ~2x tail pad),
    #  * force >= 2 blocks when B is large enough so the "parallel" batch axis
    #    can be sharded across the 2 TensorCores on v7x,
    #  * bf16 packs 2 rows per sublane -> TB multiple of 16 in that mode.
    sub = 16 if compute_dtype == jnp.bfloat16 else 8
    n_blocks = max(1, _cdiv(B, block_b))
    if n_blocks < 2 and B >= 2 * sub:
        n_blocks = 2
    TB = _round_up(_cdiv(B, n_blocks), sub)
    Bp = TB * n_blocks

    # Lane-dense padded input slab [latent | action | zeros] -> (Bp, Kp).
    # concatenate + pad is fusible by XLA (no standalone zeros write).
    x = jnp.concatenate([latent_state.astype(compute_dtype),
                         action_embedding.astype(compute_dtype)], axis=1)
    x = jnp.pad(x, ((0, Bp - B), (0, Kp - 2 * L)))

    def row_spec(cols):
        return pl.BlockSpec((TB, cols), lambda i: (i, 0),
                            memory_space=pltpu.MemorySpace.VMEM)

    def resident_spec(shape):
        return pl.BlockSpec(shape, lambda i: (0, 0),
                            memory_space=pltpu.MemorySpace.VMEM)

    weight_args = (kp["w1"], kp["b1"], kp["w2"], kp["b2"],
                   kp["w3c"], kp["b3c"], kp["wr2"], kp["rmask"])

    flops = 2 * Bp * Hp * (Kp + Hp + Wc) + 2 * Bp * Hp
    bytes_accessed = (x.size * x.dtype.itemsize + Bp * Op * 4
                      + sum(int(a.size) * a.dtype.itemsize for a in weight_args))
    cost = pl.CostEstimate(flops=flops, transcendentals=0,
                           bytes_accessed=int(bytes_accessed))

    out = pl.pallas_call(
        functools.partial(_dynamics_kernel, op_width=Op),
        out_shape=jax.ShapeDtypeStruct((Bp, Op), jnp.float32),
        grid=(n_blocks,),
        in_specs=[row_spec(Kp)] + [resident_spec(a.shape) for a in weight_args],
        out_specs=row_spec(Op),
        compiler_params=pltpu.CompilerParams(
            dimension_semantics=("parallel",),
            vmem_limit_bytes=32 * 1024 * 1024),
        cost_estimate=cost,
    )(x, *weight_args)

    next_latent = out[:B, :L]
    predicted_reward = out[:B, L:L + 1]
    return next_latent, predicted_reward


def init_params(key, latent_dim, hidden_dim):
    """Deterministic PyTorch-Linear-style init (uniform +/- 1/sqrt(fan_in))."""
    ks = jax.random.split(key, 10)

    def linear(kw, kb, fan_in, fan_out):
        bound = 1.0 / jnp.sqrt(float(fan_in))
        w = jax.random.uniform(kw, (fan_in, fan_out), jnp.float32, -bound, bound)
        b = jax.random.uniform(kb, (1, fan_out), jnp.float32, -bound, bound)
        return w, b

    L, H = latent_dim, hidden_dim
    w1, b1 = linear(ks[0], ks[1], 2 * L, H)     # dynamics Linear(2L, H)
    w2, b2 = linear(ks[2], ks[3], H, H)         # dynamics Linear(H, H)
    w3, b3 = linear(ks[4], ks[5], H, L)         # dynamics Linear(H, L)
    wr1, br1 = linear(ks[6], ks[7], L, H)       # reward Linear(L, H)
    wr2, br2 = linear(ks[8], ks[9], H, 1)       # reward Linear(H, 1)

    return {"w1": w1, "b1": b1, "w2": w2, "b2": b2, "w3": w3, "b3": b3,
            "wr1": wr1, "br1": br1, "wr2": wr2, "br2": br2}


def _reference(latent, action, p):
    """Pure-JAX reference matching the PyTorch forward exactly."""
    x = jnp.concatenate([latent, action], axis=1)
    h = jnp.maximum(x @ p["w1"] + p["b1"], 0.0)
    h = jnp.maximum(h @ p["w2"] + p["b2"], 0.0)
    nl = h @ p["w3"] + p["b3"]
    r = jnp.maximum(nl @ p["wr1"] + p["br1"], 0.0)
    rew = r @ p["wr2"] + p["br2"]
    return nl, rew


if __name__ == "__main__":
    B, LATENT_DIM, HIDDEN_DIM = 8, 32, 64

    key = jax.random.PRNGKey(0)
    k_lat, k_act, k_par = jax.random.split(key, 3)

    latent_state = jax.random.normal(k_lat, (B, LATENT_DIM), jnp.float32)
    action_embedding = jax.random.normal(k_act, (B, LATENT_DIM), jnp.float32)
    params = init_params(k_par, LATENT_DIM, HIDDEN_DIM)

    next_latent, predicted_reward = latent_dynamics_forward(
        latent_state, action_embedding, params)
    jax.block_until_ready((next_latent, predicted_reward))

    ref_nl, ref_rew = _reference(latent_state, action_embedding, params)
    assert next_latent.shape == (B, LATENT_DIM)
    assert predicted_reward.shape == (B, 1)
    # next_latent path is numerically identical layout plumbing (zero-padding only).
    assert jnp.allclose(next_latent, ref_nl, atol=1e-5, rtol=1e-5)
    # reward path uses the algebraic w3->wr1 fold + VPU reduce (reassociated f32),
    # so it carries a slightly looser tolerance contract.
    assert jnp.allclose(predicted_reward, ref_rew, atol=1e-4, rtol=1e-4)

    print("KERNEL_OK")
</pallas_src>

<mosaic_0001>
module attributes {stable_mosaic.version = 11 : i64} {
  func.func @_dynamics_kernel(%arg0: i32, %arg1: memref<8x128xf32, #tpu.memory_space<vmem>>, %arg2: memref<128x128xf32, #tpu.memory_space<vmem>>, %arg3: memref<1x128xf32, #tpu.memory_space<vmem>>, %arg4: memref<128x128xf32, #tpu.memory_space<vmem>>, %arg5: memref<1x128xf32, #tpu.memory_space<vmem>>, %arg6: memref<128x256xf32, #tpu.memory_space<vmem>>, %arg7: memref<1x256xf32, #tpu.memory_space<vmem>>, %arg8: memref<1x128xf32, #tpu.memory_space<vmem>>, %arg9: memref<1x128xf32, #tpu.memory_space<vmem>>, %arg10: memref<8x128xf32, #tpu.memory_space<vmem>>) attributes {dimension_semantics = [#tpu.dimension_semantics<parallel>], iteration_bounds = array<i64: 1>, scalar_prefetch = 0 : i64, scratch_operands = 0 : i64, tpu.core_type = #tpu.core_type<tc>, window_params = [{transform_indices = @transform_0, window_bounds = array<i64: 8, 128>}, {pipeline_mode = #tpu.pipeline_mode<synchronous>, transform_indices = @transform_1, window_bounds = array<i64: 128, 128>}, {pipeline_mode = #tpu.pipeline_mode<synchronous>, transform_indices = @transform_2, window_bounds = array<i64: 1, 128>}, {pipeline_mode = #tpu.pipeline_mode<synchronous>, transform_indices = @transform_3, window_bounds = array<i64: 128, 128>}, {pipeline_mode = #tpu.pipeline_mode<synchronous>, transform_indices = @transform_4, window_bounds = array<i64: 1, 128>}, {pipeline_mode = #tpu.pipeline_mode<synchronous>, transform_indices = @transform_5, window_bounds = array<i64: 128, 256>}, {pipeline_mode = #tpu.pipeline_mode<synchronous>, transform_indices = @transform_6, window_bounds = array<i64: 1, 256>}, {pipeline_mode = #tpu.pipeline_mode<synchronous>, transform_indices = @transform_7, window_bounds = array<i64: 1, 128>}, {pipeline_mode = #tpu.pipeline_mode<synchronous>, transform_indices = @transform_8, window_bounds = array<i64: 1, 128>}, {transform_indices = @transform_9, window_bounds = array<i64: 8, 128>}]} {
    %c0 = arith.constant 0 : index
    %c0_0 = arith.constant 0 : index
    %0 = vector.load %arg3[%c0, %c0_0] : memref<1x128xf32, #tpu.memory_space<vmem>>, vector<1x128xf32>
    %c0_1 = arith.constant 0 : index
    %c0_2 = arith.constant 0 : index
    %1 = vector.load %arg5[%c0_1, %c0_2] : memref<1x128xf32, #tpu.memory_space<vmem>>, vector<1x128xf32>
    %c0_3 = arith.constant 0 : index
    %c0_4 = arith.constant 0 : index
    %2 = vector.load %arg7[%c0_3, %c0_4] : memref<1x256xf32, #tpu.memory_space<vmem>>, vector<1x256xf32>
    %c0_5 = arith.constant 0 : index
    %c0_6 = arith.constant 0 : index
    %3 = vector.load %arg8[%c0_5, %c0_6] : memref<1x128xf32, #tpu.memory_space<vmem>>, vector<1x128xf32>
    %c0_7 = arith.constant 0 : index
    %c0_8 = arith.constant 0 : index
    %4 = vector.load %arg9[%c0_7, %c0_8] : memref<1x128xf32, #tpu.memory_space<vmem>>, vector<1x128xf32>
    %c0_9 = arith.constant 0 : index
    %c0_10 = arith.constant 0 : index
    %5 = vector.load %arg1[%c0_9, %c0_10] : memref<8x128xf32, #tpu.memory_space<vmem>>, vector<8x128xf32>
    %c0_11 = arith.constant 0 : index
    %c0_12 = arith.constant 0 : index
    %6 = vector.load %arg2[%c0_11, %c0_12] : memref<128x128xf32, #tpu.memory_space<vmem>>, vector<128x128xf32>
    %cst = arith.constant dense<0.000000e+00> : vector<8x128xf32>
    %7 = tpu.matmul %5, %6, %cst {dimension_numbers = #tpu.dot_dimension_numbers<[1], [0], [0], [1], [0, 0, 1, 1], [], []>} : vector<8x128xf32>, vector<128x128xf32>, vector<8x128xf32> -> vector<8x128xf32>
    %8 = vector.broadcast %0 : vector<1x128xf32> to vector<8x128xf32>
    %9 = arith.addf %7, %8 : vector<8x128xf32>
    %cst_13 = arith.constant 0.000000e+00 : f32
    %10 = vector.broadcast %cst_13 : f32 to vector<8x128xf32>
    %11 = arith.maximumf %9, %10 : vector<8x128xf32>
    %c0_14 = arith.constant 0 : index
    %c0_15 = arith.constant 0 : index
    %12 = vector.load %arg4[%c0_14, %c0_15] : memref<128x128xf32, #tpu.memory_space<vmem>>, vector<128x128xf32>
    %cst_16 = arith.constant dense<0.000000e+00> : vector<8x128xf32>
    %13 = tpu.matmul %11, %12, %cst_16 {dimension_numbers = #tpu.dot_dimension_numbers<[1], [0], [0], [1], [0, 0, 1, 1], [], []>} : vector<8x128xf32>, vector<128x128xf32>, vector<8x128xf32> -> vector<8x128xf32>
    %14 = vector.broadcast %1 : vector<1x128xf32> to vector<8x128xf32>
    %15 = arith.addf %13, %14 : vector<8x128xf32>
    %cst_17 = arith.constant 0.000000e+00 : f32
    %16 = vector.broadcast %cst_17 : f32 to vector<8x128xf32>
    %17 = arith.maximumf %15, %16 : vector<8x128xf32>
    %c0_18 = arith.constant 0 : index
    %c0_19 = arith.constant 0 : index
    %18 = vector.load %arg6[%c0_18, %c0_19] : memref<128x256xf32, #tpu.memory_space<vmem>>, vector<128x256xf32>
    %cst_20 = arith.constant dense<0.000000e+00> : vector<8x256xf32>
    %19 = tpu.matmul %17, %18, %cst_20 {dimension_numbers = #tpu.dot_dimension_numbers<[1], [0], [0], [1], [0, 0, 1, 1], [], []>} : vector<8x128xf32>, vector<128x256xf32>, vector<8x256xf32> -> vector<8x256xf32>
    %20 = vector.broadcast %2 : vector<1x256xf32> to vector<8x256xf32>
    %21 = arith.addf %19, %20 : vector<8x256xf32>
    %22 = vector.extract_strided_slice %21 {offsets = [0, 0], sizes = [8, 128], strides = [1, 1]} : vector<8x256xf32> to vector<8x128xf32>
    %23 = vector.extract_strided_slice %21 {offsets = [0, 128], sizes = [8, 128], strides = [1, 1]} : vector<8x256xf32> to vector<8x128xf32>
    %cst_21 = arith.constant 0.000000e+00 : f32
    %24 = vector.broadcast %cst_21 : f32 to vector<8x128xf32>
    %25 = arith.maximumf %23, %24 : vector<8x128xf32>
    %26 = vector.broadcast %3 : vector<1x128xf32> to vector<8x128xf32>
    %27 = arith.mulf %25, %26 : vector<8x128xf32>
    %cst_22 = arith.constant dense<0.000000e+00> : vector<8xf32>
    %28 = vector.multi_reduction <add>, %27, %cst_22 [1] : vector<8x128xf32> to vector<8xf32>
    %29 = vector.shape_cast %28 : vector<8xf32> to vector<8x1xf32>
    %30 = vector.broadcast %29 : vector<8x1xf32> to vector<8x128xf32>
    %31 = vector.broadcast %4 : vector<1x128xf32> to vector<8x128xf32>
    %32 = arith.mulf %30, %31 : vector<8x128xf32>
    %33 = arith.addf %22, %32 : vector<8x128xf32>
    %c0_23 = arith.constant 0 : index
    %c0_24 = arith.constant 0 : index
    %34 = vector.load %arg10[%c0_23, %c0_24] : memref<8x128xf32, #tpu.memory_space<vmem>>, vector<8x128xf32>
    tpu.vector_store %arg10[%c0_23, %c0_24], %33 {strides = array<i32>} : memref<8x128xf32, #tpu.memory_space<vmem>>, vector<8x128xf32>,
    return
  }
  func.func @transform_0(%arg0: i32) -> (i32, i32) {
    %c0_i32 = arith.constant 0 : i32
    %c0_i32_0 = arith.constant 0 : i32
    return %arg0, %c0_i32 : i32, i32
  }
  func.func @transform_1(%arg0: i32) -> (i32, i32) {
    %c0_i32 = arith.constant 0 : i32
    %c0_i32_0 = arith.constant 0 : i32
    %c0_i32_1 = arith.constant 0 : i32
    return %c0_i32, %c0_i32_0 : i32, i32
  }
  func.func @transform_2(%arg0: i32) -> (i32, i32) {
    %c0_i32 = arith.constant 0 : i32
    %c0_i32_0 = arith.constant 0 : i32
    %c0_i32_1 = arith.constant 0 : i32
    return %c0_i32, %c0_i32_0 : i32, i32
  }
  func.func @transform_3(%arg0: i32) -> (i32, i32) {
    %c0_i32 = arith.constant 0 : i32
    %c0_i32_0 = arith.constant 0 : i32
    %c0_i32_1 = arith.constant 0 : i32
    return %c0_i32, %c0_i32_0 : i32, i32
  }
  func.func @transform_4(%arg0: i32) -> (i32, i32) {
    %c0_i32 = arith.constant 0 : i32
    %c0_i32_0 = arith.constant 0 : i32
    %c0_i32_1 = arith.constant 0 : i32
    return %c0_i32, %c0_i32_0 : i32, i32
  }
  func.func @transform_5(%arg0: i32) -> (i32, i32) {
    %c0_i32 = arith.constant 0 : i32
    %c0_i32_0 = arith.constant 0 : i32
    %c0_i32_1 = arith.constant 0 : i32
    return %c0_i32, %c0_i32_0 : i32, i32
  }
  func.func @transform_6(%arg0: i32) -> (i32, i32) {
    %c0_i32 = arith.constant 0 : i32
    %c0_i32_0 = arith.constant 0 : i32
    %c0_i32_1 = arith.constant 0 : i32
    return %c0_i32, %c0_i32_0 : i32, i32
  }
  func.func @transform_7(%arg0: i32) -> (i32, i32) {
    %c0_i32 = arith.constant 0 : i32
    %c0_i32_0 = arith.constant 0 : i32
    %c0_i32_1 = arith.constant 0 : i32
    return %c0_i32, %c0_i32_0 : i32, i32
  }
  func.func @transform_8(%arg0: i32) -> (i32, i32) {
    %c0_i32 = arith.constant 0 : i32
    %c0_i32_0 = arith.constant 0 : i32
    %c0_i32_1 = arith.constant 0 : i32
    return %c0_i32, %c0_i32_0 : i32, i32
  }
  func.func @transform_9(%arg0: i32) -> (i32, i32) {
    %c0_i32 = arith.constant 0 : i32
    %c0_i32_0 = arith.constant 0 : i32
    return %arg0, %c0_i32 : i32, i32
  }
}

</mosaic_0001>

<bundles_post_ra>
// kernel: tpu_custom_call.1
= control target key start
LH: loop header
LB: loop body
LE: loop exit
PB: predicated region body
PF: predicated region fallthrough
CT: control target
= control target key end

     0   :  { %14 = vsyncpa [#allocation3], 0  ;;  %s781_s0 = inlined_call_operand.hbm [shape: f32[8,128], index: 0, kind: input, shape index: {}]   ;;  %s782_s1 = inlined_call_operand.hbm [shape: f32[128,128], index: 1, kind: input, shape index: {}]   ;;  %s783_s2 = inlined_call_operand.vmem [shape: f32[1,128], index: 2, kind: input, shape index: {}]   ;;  %s784_s3 = inlined_call_operand.hbm [shape: f32[128,128], index: 3, kind: input, shape index: {}]   ;;  %s785_s4 = inlined_call_operand.vmem [shape: f32[1,128], index: 4, kind: input, shape index: {}]   ;;  %s786_s5 = inlined_call_operand.hbm [shape: f32[128,256], index: 5, kind: input, shape index: {}]   ;;  %s787_s6 = inlined_call_operand.vmem [shape: f32[1,256], index: 6, kind: input, shape index: {}]   ;;  %s788_s7 = inlined_call_operand.vmem [shape: f32[1,128], index: 7, kind: input, shape index: {}]   ;;  %s789_s8 = inlined_call_operand.vmem [shape: f32[1,128], index: 8, kind: input, shape index: {}]   ;;  %s790_s9 = inlined_call_operand.hbm [shape: f32[8,128], index: 9, kind: output, shape index: {}]  }
   0x1   :  { %15 = vsyncpa [#allocation6], 0 }
   0x2   :  { %16 = vsyncpa [#allocation9], 0 }
   0x3   :  { %17 = vsyncpa [#allocation4], 0  ;;  %s655_s30 = smov [#allocation5]  }
   0x4   :  { %s33_s10 = sshll.u32 %s655_s30, 4  ;;  %s34_s10 = int_to_ptr.vmem [resolvable:$true] %s33_s10 }
   0x5   :  { %s555_s11 = scalar_lea.vmem %s34_s10, 2048  ;;  %p560_p1 = scmp.lt.s32.totalorder %s34_s10, %s34_s10 }
   0x6   :  { %p556_p0 = scmp.ne.s32.totalorder %s34_s10, %s555_s11  ;;  %p561_p2 = scmp.lt.s32.totalorder %s555_s11, %s555_s11 }
   0x8   :  { %p562_p3 = por %p561_p2, %p560_p1 }
   0xa   :  { %p563_p4 = pnand %p562_p3, %p556_p0 }
   0xc   :  { %566 = shalt.err (!%p563_p4)
}
   0xd   :  { %s656_s12 = smov 128   ;;  %s657_s13 = smov 8  }
   0xe   :  { %39 = dma.hbm_to_vmem [thread:$0]  %s782_s1, 2048, %s34_s10, [#allocation6], %s656_s12, %s656_s12, %s657_s13  }
   0xf   :  { %s658_s16 = smov [#allocation2]   ;;  %s659_s18 = smov [#allocation7]  }
  0x10   :  { %s24_s17 = sshll.u32 %s658_s16, 4  ;;  %s47_s19 = sshll.u32 %s659_s18, 4  ;;  %s25_s17 = int_to_ptr.vmem [resolvable:$true] %s24_s17  ;;  %s48_s19 = int_to_ptr.vmem [resolvable:$true] %s47_s19 }
  0x11   :  { %s575_s20 = scalar_lea.vmem %s25_s17, 128  ;;  %p580_p6 = scmp.lt.s32.totalorder %s25_s17, %s25_s17 }
  0x12   :  { %p576_p5 = scmp.ne.s32.totalorder %s25_s17, %s575_s20  ;;  %p581_p7 = scmp.lt.s32.totalorder %s575_s20, %s575_s20 }
  0x14   :  { %p582_p8 = por %p581_p7, %p580_p6 }
  0x16   :  { %p583_p9 = pnand %p582_p8, %p576_p5 }
  0x18   :  { %586 = shalt.err (!%p583_p9)
}
  0x19   :  { %27 = dma.hbm_to_vmem [thread:$0]  %s781_s0, 128, %s25_s17, [#allocation3]  }
  0x1a   :  { %s595_s23 = scalar_lea.vmem %s48_s19, 2048  ;;  %p600_p11 = scmp.lt.s32.totalorder %s48_s19, %s48_s19 }
  0x1b   :  { %p596_p10 = scmp.ne.s32.totalorder %s48_s19, %s595_s23  ;;  %p601_p12 = scmp.lt.s32.totalorder %s595_s23, %s595_s23 }
  0x1d   :  { %p602_p13 = por %p601_p12, %p600_p11 }
  0x1f   :  { %p603_p0 = pnand %p602_p13, %p596_p10 }
  0x21   :  { %606 = shalt.err (!%p603_p0)
}
  0x22   :  { %53 = dma.hbm_to_vmem [thread:$0]  %s784_s3, 2048, %s48_s19, [#allocation6], %s656_s12, %s656_s12, %s657_s13  }
  0x23   :  { %s660_s25 = smov [#allocation8]  }
  0x24   :  { %s61_s26 = sshll.u32 %s660_s25, 4  ;;  %s62_s26 = int_to_ptr.vmem [resolvable:$true] %s61_s26 }
  0x25   :  { %s615_s27 = scalar_lea.vmem %s62_s26, 4096  ;;  %p620_p2 = scmp.lt.s32.totalorder %s62_s26, %s62_s26 }
  0x26   :  { %p616_p1 = scmp.ne.s32.totalorder %s62_s26, %s615_s27  ;;  %p621_p3 = scmp.lt.s32.totalorder %s615_s27, %s615_s27 }
  0x28   :  { %p622_p4 = por %p621_p3, %p620_p2 }
  0x2a   :  { %p623_p5 = pnand %p622_p4, %p616_p1 }
  0x2c   :  { %626 = shalt.err (!%p623_p5)
}
  0x2d   :  { %s661_s0 = smov 256   ;;  %s662_s28 = smov 16  }
  0x2e   :  { %67 = dma.hbm_to_vmem [thread:$0]  %s786_s5, 4096, %s62_s26, [#allocation9], %s661_s0, %s661_s0, %s662_s28  }
  0x2f   :  { %647 = dma.done.wait [#allocation3], 128  }
  0x30   :  { %648 = vsyncadd [#allocation3], 4294967168 }
  0x31   :  { %649 = dma.done.wait [#allocation6], 4096  }
  0x32   :  { %650 = vsyncadd [#allocation6], 4294963200 }
  0x33   :  { %651 = dma.done.wait [#allocation9], 4096  }
  0x34   :  { %652 = vsyncadd [#allocation9], 4294963200  ;;  %v663_v0 = vmov 0.0   ;;  %vm664_vm0 = vmmov 0   ;;  %v107_v1 = vld [vmem:[#allocation5 + $0x78] sm:$0xff]  ;;  %v106_v2 = vld [vmem:[#allocation5 + $0x70] sm:$0xff] }
  0x35   :  { %466 = vmatprep.subr.mxu0 %v663_v0  ;;  %498 = vmatprep.mubr.msk.f32.mxu0 %vm664_vm0, %v663_v0  ;;  %v105_v3 = vld [vmem:[#allocation5 + $0x68] sm:$0xff]  ;;  %v104_v4 = vld [vmem:[#allocation5 + $0x60] sm:$0xff]  ;;  %v200_v5 = vld [vmem:[#allocation7 + $0x78] sm:$0xff]  ;;  %s665_s16 = smov [#allocation10]  }
  0x36   :  { %501 = vmatprep.subr.mxu1 %v663_v0  ;;  %533 = vmatprep.mubr.msk.f32.mxu1 %vm664_vm0, %v663_v0  ;;  %v103_v6 = vld [vmem:[#allocation5 + $0x58] sm:$0xff]  ;;  %v199_v7 = vld [vmem:[#allocation7 + $0x70] sm:$0xff]  ;;  %v198_v8 = vld [vmem:[#allocation7 + $0x68] sm:$0xff] }
  0x37   :  { %467 = vmatpush3.msra.mxu0 %v107_v1  ;;  %502 = vmatpush3.msra.mxu1 %v200_v5  ;;  %v102_v9 = vld [vmem:[#allocation5 + $0x50] sm:$0xff]  ;;  %v197_v10 = vld [vmem:[#allocation7 + $0x60] sm:$0xff]  ;;  %v101_v11 = vld [vmem:[#allocation5 + $0x48] sm:$0xff] }
  0x38   :  { %468 = vmatprep.subr.mxu0 %v663_v0  ;;  %503 = vmatprep.subr.mxu1 %v663_v0  ;;  %v196_v12 = vld [vmem:[#allocation7 + $0x58] sm:$0xff]  ;;  %v100_v13 = vld [vmem:[#allocation5 + $0x40] sm:$0xff]  ;;  %v195_v14 = vld [vmem:[#allocation7 + $0x50] sm:$0xff] }
  0x39   :  { %469 = vmatpush3.msra.mxu0 %v106_v2  ;;  %504 = vmatpush3.msra.mxu1 %v199_v7  ;;  %v99_v15 = vld [vmem:[#allocation5 + $0x38] sm:$0xff]  ;;  %v194_v16 = vld [vmem:[#allocation7 + $0x48] sm:$0xff]  ;;  %v98_v17 = vld [vmem:[#allocation5 + $0x30] sm:$0xff] }
  0x3a   :  { %470 = vmatprep.subr.mxu0 %v663_v0  ;;  %505 = vmatprep.subr.mxu1 %v663_v0  ;;  %v193_v18 = vld [vmem:[#allocation7 + $0x40] sm:$0xff]  ;;  %v97_v19 = vld [vmem:[#allocation5 + $0x28] sm:$0xff]  ;;  %v192_v20 = vld [vmem:[#allocation7 + $0x38] sm:$0xff] }
  0x3b   :  { %471 = vmatpush3.msra.mxu0 %v105_v3  ;;  %506 = vmatpush3.msra.mxu1 %v198_v8  ;;  %v96_v21 = vld [vmem:[#allocation5 + $0x20] sm:$0xff]  ;;  %v191_v22 = vld [vmem:[#allocation7 + $0x30] sm:$0xff]  ;;  %v95_v23 = vld [vmem:[#allocation5 + $0x18] sm:$0xff] }
  0x3c   :  { %472 = vmatprep.subr.mxu0 %v663_v0  ;;  %507 = vmatprep.subr.mxu1 %v663_v0  ;;  %v190_v24 = vld [vmem:[#allocation7 + $0x28] sm:$0xff]  ;;  %v94_v25 = vld [vmem:[#allocation5 + $0x10] sm:$0xff]  ;;  %v189_v26 = vld [vmem:[#allocation7 + $0x20] sm:$0xff] }
  0x3d   :  { %473 = vmatpush3.msra.mxu0 %v104_v4  ;;  %508 = vmatpush3.msra.mxu1 %v197_v10  ;;  %v93_v27 = vld [vmem:[#allocation5 + $0x8] sm:$0xff]  ;;  %v188_v28 = vld [vmem:[#allocation7 + $0x18] sm:$0xff]  ;;  %v92_v29 = vld [vmem:[#allocation5] sm:$0xff] }
  0x3e   :  { %474 = vmatprep.subr.mxu0 %v663_v0  ;;  %509 = vmatprep.subr.mxu1 %v663_v0  ;;  %v91_v30 = vld [vmem:[#allocation2] sm:$0xff]  ;;  %v187_v31 = vld [vmem:[#allocation7 + $0x10] sm:$0xff]  ;;  %v186_v32 = vld [vmem:[#allocation7 + $0x8] sm:$0xff] }
  0x3f   :  { %475 = vmatpush3.msra.mxu0 %v103_v6  ;;  %510 = vmatpush3.msra.mxu1 %v196_v12  ;;  %v185_v33 = vld [vmem:[#allocation7] sm:$0xff]  ;;  %v309_v34 = vld [vmem:[#allocation8 + $0xf8] sm:$0xff]  ;;  %v308_v35 = vld [vmem:[#allocation8 + $0xf0] sm:$0xff]  ;;  %v311_v12 = vlaneseq }
  0x40   :  { %476 = vmatprep.subr.mxu0 %v663_v0  ;;  %511 = vmatprep.subr.mxu1 %v663_v0  ;;  %v307_v36 = vld [vmem:[#allocation8 + $0xe8] sm:$0xff]  ;;  %v306_v37 = vld [vmem:[#allocation8 + $0xe0] sm:$0xff]  ;;  %v305_v38 = vld [vmem:[#allocation8 + $0xd8] sm:$0xff] }
  0x41   :  { %477 = vmatpush3.msra.mxu0 %v102_v9  ;;  %512 = vmatpush3.msra.mxu1 %v195_v14  ;;  %v304_v39 = vld [vmem:[#allocation8 + $0xd0] sm:$0xff]  ;;  %v303_v40 = vld [vmem:[#allocation8 + $0xc8] sm:$0xff]  ;;  %v302_v41 = vld [vmem:[#allocation8 + $0xc0] sm:$0xff] }
  0x42   :  { %478 = vmatprep.subr.mxu0 %v663_v0  ;;  %513 = vmatprep.subr.mxu1 %v663_v0  ;;  %v301_v42 = vld [vmem:[#allocation8 + $0xb8] sm:$0xff]  ;;  %v300_v43 = vld [vmem:[#allocation8 + $0xb0] sm:$0xff]  ;;  %v299_v44 = vld [vmem:[#allocation8 + $0xa8] sm:$0xff] }
  0x43   :  { %479 = vmatpush3.msra.mxu0 %v101_v11  ;;  %514 = vmatpush3.msra.mxu1 %v194_v16  ;;  %v298_v45 = vld [vmem:[#allocation8 + $0xa0] sm:$0xff]  ;;  %v297_v46 = vld [vmem:[#allocation8 + $0x98] sm:$0xff]  ;;  %v296_v47 = vld [vmem:[#allocation8 + $0x90] sm:$0xff] }
  0x44   :  { %480 = vmatprep.subr.mxu0 %v663_v0  ;;  %515 = vmatprep.subr.mxu1 %v663_v0  ;;  %v295_v48 = vld [vmem:[#allocation8 + $0x88] sm:$0xff]  ;;  %v294_v49 = vld [vmem:[#allocation8 + $0x80] sm:$0xff]  ;;  %v293_v50 = vld [vmem:[#allocation8 + $0x78] sm:$0xff] }
  0x45   :  { %481 = vmatpush3.msra.mxu0 %v100_v13  ;;  %516 = vmatpush3.msra.mxu1 %v193_v18  ;;  %v292_v51 = vld [vmem:[#allocation8 + $0x70] sm:$0xff]  ;;  %v291_v52 = vld [vmem:[#allocation8 + $0x68] sm:$0xff]  ;;  %v290_v53 = vld [vmem:[#allocation8 + $0x60] sm:$0xff]  ;;  %v312_v13 = vshrl.u32 %v311_v12, 7 }
  0x46   :  { %482 = vmatprep.subr.mxu0 %v663_v0  ;;  %517 = vmatprep.subr.mxu1 %v663_v0  ;;  %v289_v54 = vld [vmem:[#allocation8 + $0x58] sm:$0xff]  ;;  %v288_v55 = vld [vmem:[#allocation8 + $0x50] sm:$0xff]  ;;  %v287_v56 = vld [vmem:[#allocation8 + $0x48] sm:$0xff] }
  0x47   :  { %483 = vmatpush3.msra.mxu0 %v99_v15  ;;  %518 = vmatpush3.msra.mxu1 %v192_v20  ;;  %v286_v57 = vld [vmem:[#allocation8 + $0x40] sm:$0xff]  ;;  %v285_v58 = vld [vmem:[#allocation8 + $0x38] sm:$0xff]  ;;  %v284_v59 = vld [vmem:[#allocation8 + $0x30] sm:$0xff]  ;;  %v317_v14 = vsub.s32 1, %v312_v13 }
  0x48   :  { %484 = vmatprep.subr.mxu0 %v663_v0  ;;  %519 = vmatprep.subr.mxu1 %v663_v0  ;;  %v283_v60 = vld [vmem:[#allocation8 + $0x28] sm:$0xff]  ;;  %v428_v61 = vld [vmem:[%s783_s2] ss:$0 sm:$0xff]  ;;  %v282_v2 = vld [vmem:[#allocation8 + $0x20] sm:$0xff] }
  0x49   :  { %485 = vmatpush3.msra.mxu0 %v98_v17  ;;  %520 = vmatpush3.msra.mxu1 %v191_v22  ;;  %v281_v3 = vld [vmem:[#allocation8 + $0x18] sm:$0xff]  ;;  %v280_v4 = vld [vmem:[#allocation8 + $0x10] sm:$0xff]  ;;  %v279_v5 = vld [vmem:[#allocation8 + $0x8] sm:$0xff] }
  0x4a   :  { %486 = vmatprep.subr.mxu0 %v663_v0  ;;  %521 = vmatprep.subr.mxu1 %v663_v0  ;;  %v278_v6 = vld [vmem:[#allocation8] sm:$0xff]  ;;  %v429_v7 = vld [vmem:[%s785_s4] ss:$0 sm:$0xff] }
  0x4b   :  { %487 = vmatpush3.msra.mxu0 %v97_v19  ;;  %522 = vmatpush3.msra.mxu1 %v190_v24  ;;  %v88_v15 = vld [vmem:[%s787_s6] sm:$0x3]  ;;  %s417_s6 = sshll.u32 %s665_s16, 4  ;;  %s418_s6 = int_to_ptr.vmem [resolvable:$true] %s417_s6 }
  0x4c   :  { %488 = vmatprep.subr.mxu0 %v663_v0  ;;  %523 = vmatprep.subr.mxu1 %v663_v0  ;;  %v318_v16 = vrot.slane %v88_v15, %v317_v14  ;;  %v430_v20 = vld [vmem:[%s788_s7] ss:$0 sm:$0xff]  ;;  %s627_s17 = scalar_lea.vmem %s418_s6, 128  ;;  %p632_p7 = scmp.lt.s32.totalorder %s418_s6, %s418_s6 }
  0x4d   :  { %489 = vmatpush3.msra.mxu0 %v96_v21  ;;  %524 = vmatpush3.msra.mxu1 %v189_v26  ;;  %p628_p6 = scmp.ne.s32.totalorder %s418_s6, %s627_s17  ;;  %p633_p8 = scmp.lt.s32.totalorder %s627_s17, %s627_s17 }
  0x4e   :  { %490 = vmatprep.subr.mxu0 %v663_v0  ;;  %525 = vmatprep.subr.mxu1 %v663_v0 }
  0x4f   :  { %491 = vmatpush3.msra.mxu0 %v95_v23  ;;  %526 = vmatpush3.msra.mxu1 %v188_v28  ;;  %v313_v23 = vsub.s32 0, %v312_v13  ;;  %p634_p9 = por %p633_p8, %p632_p7 }
  0x50   :  { %492 = vmatprep.subr.mxu0 %v663_v0  ;;  %527 = vmatprep.subr.mxu1 %v663_v0 }
  0x51   :  { %493 = vmatpush3.msra.mxu0 %v94_v25  ;;  %528 = vmatpush3.msra.mxu1 %v187_v31  ;;  %v314_v24 = vrot.slane %v88_v15, %v313_v23  ;;  %v431_v25 = vld [vmem:[%s789_s8] ss:$0 sm:$0xff]  ;;  %p635_p10 = pnand %p634_p9, %p628_p6 }
  0x52   :  { %494 = vmatprep.subr.mxu0 %v663_v0  ;;  %529 = vmatprep.subr.mxu1 %v663_v0 }
  0x53   :  { %495 = vmatpush3.msra.mxu0 %v93_v27  ;;  %530 = vmatpush3.msra.mxu1 %v186_v32 }
  0x54   :  { %496 = vmatprep.subr.mxu0 %v663_v0  ;;  %531 = vmatprep.subr.mxu1 %v663_v0 }
  0x55   :  { %497 = vmatpush3.msra.mxu0 %v92_v29  ;;  %532 = vmatpush3.msra.mxu1 %v185_v33 }
  0x56   :  { %499 = vmatmul.mubr.f32.vlgmr.msra.gmra.mxu0 %v91_v30  ;;  %321 = vmatprep.subr.mxu0 %v309_v34 }
  0x57   :  { %385 = vmatprep.mubr.f32.mxu0 %v663_v0  ;;  %322 = vmatpush1.msra.mxu0 %v308_v35 }
  0x58   :  { %323 = vmatprep.subr.mxu0 %v307_v36 }
  0x59   :  { %324 = vmatpush1.msra.mxu0 %v306_v37 }
  0x5a   :  { %325 = vmatprep.subr.mxu0 %v305_v38 }
  0x5b   :  { %326 = vmatpush1.msra.mxu0 %v304_v39 }
  0x5c   :  { %327 = vmatprep.subr.mxu0 %v303_v40 }
  0x5d   :  { %328 = vmatpush1.msra.mxu0 %v302_v41 }
  0x5e   :  { %329 = vmatprep.subr.mxu0 %v301_v42 }
  0x5f   :  { %330 = vmatpush1.msra.mxu0 %v300_v43 }
  0x60   :  { %331 = vmatprep.subr.mxu0 %v299_v44 }
  0x61   :  { %332 = vmatpush1.msra.mxu0 %v298_v45 }
  0x62   :  { %333 = vmatprep.subr.mxu0 %v297_v46 }
  0x63   :  { %334 = vmatpush1.msra.mxu0 %v296_v47 }
  0x64   :  { %335 = vmatprep.subr.mxu0 %v295_v48 }
  0x65   :  { %336 = vmatpush1.msra.mxu0 %v294_v49 }
  0x66   :  { %337 = vmatprep.subr.mxu0 %v293_v50 }
  0x67   :  { %338 = vmatpush1.msra.mxu0 %v292_v51 }
  0x68   :  { %339 = vmatprep.subr.mxu0 %v291_v52 }
  0x69   :  { %340 = vmatpush1.msra.mxu0 %v290_v53 }
  0x6a   :  { %341 = vmatprep.subr.mxu0 %v289_v54 }
  0x6b   :  { %342 = vmatpush1.msra.mxu0 %v288_v55 }
  0x6c   :  { %343 = vmatprep.subr.mxu0 %v287_v56 }
  0x6d   :  { %344 = vmatpush1.msra.mxu0 %v286_v57 }
  0x6e   :  { %345 = vmatprep.subr.mxu0 %v285_v58 }
  0x6f   :  { %346 = vmatpush1.msra.mxu0 %v284_v59 }
  0x70   :  { %347 = vmatprep.subr.mxu0 %v283_v60 }
  0x71   :  { %348 = vmatpush1.msra.mxu0 %v282_v2 }
  0x72   :  { %349 = vmatprep.subr.mxu0 %v281_v3 }
  0x73   :  { %350 = vmatpush1.msra.mxu0 %v280_v4 }
  0x74   :  { %351 = vmatprep.subr.mxu0 %v279_v5 }
  0x75   :  { %352 = vmatpush1.msra.mxu0 %v278_v6 }
 0x116   :  { %v180_v62 = vpop.f32.mrf.mxu0 }
 0x117   :  { %v181_v63 = vadd.f32 %v428_v61, %v180_v62 }
 0x118   :  { %v500_v0 = vpop.f32.mrf.mxu0 }
 0x119   :  { %v184_v1 = vmax.f32 %v181_v63, 0.0 }
 0x11b   :  { %534 = vmatmul.mubr.f32.vlgmr.msra.gmra.mxu1 %v184_v1 }
 0x1db   :  { %v273_v8 = vpop.f32.mrf.mxu1 }
 0x1dc   :  { %v274_v9 = vadd.f32 %v429_v7, %v273_v8 }
 0x1dd   :  { %v535_v10 = vpop.f32.mrf.mxu1 }
 0x1de   :  { %v277_v11 = vmax.f32 %v274_v9, 0.0 }
 0x1e0   :  { %386 = vmatmul.mubr.f32.vlgmr.msra.gmra.mxu0 %v277_v11 }
 0x2a0   :  { %v387_v17 = vpop.f32.mrf.mxu0 }
 0x2a1   :  { %v388_v27 = vadd.f32 %v387_v17, %v314_v24 }
 0x2a2   :  { %v389_v18 = vpop.f32.mrf.mxu0 }
 0x2a3   :  { %v390_v19 = vadd.f32 %v389_v18, %v318_v16 }
 0x2a5   :  { %v392_v21 = vmax.f32 %v390_v19, 0.0 }
 0x2a7   :  { %v399_v22 = vmul.f32 %v430_v20, %v392_v21 }
 0x2a9   :  { %400 = vadd.xlane.f32.xlu0 %v399_v22 }
 0x332   :  { %v401_v26 = vpop.xlane.xlu0 %400 }
 0x333   :  { %v408_v28 = vmul.f32 %v431_v25, %v401_v26 }
 0x335   :  { %v409_v29 = vadd.f32 %v408_v28, %v388_v27 }
 0x337   :  { %410 = vst [vmem:[#allocation10] sm:$0xff] %v409_v29 }
 0x338   :  { %638 = shalt.err (!%p635_p10)
}
 0x339   :  { %420 = dma.vmem_to_hbm [thread:$0]  %s418_s6, 128, %s790_s9, [#allocation4]  }
 0x33a   :  { %653 = dma.done.wait [#allocation4], 128  }
 0x33b   :  { %654 = vsyncadd [#allocation4], 4294967168 }
 0x33c   :  { %424 = vsyncpa [#allocation3], 1 }
 0x33d   :  { %425 = vsyncpa [#allocation6], 1 }
 0x33e   :  { %426 = vsyncpa [#allocation9], 1 }
 0x33f   :  { %427 = vsyncpa [#allocation4], 1 }

</bundles_post_ra>
